<compile_context>
chip_gen: v6e
topology: v6e:2x2x1
jax: 0.10.0
libtpu: 0.0.40
codegen_flags: <defaults>
</compile_context>

<pallas_src>
import functools

import jax
import jax.numpy as jnp
from jax.experimental import pallas as pl
from jax.experimental.pallas import tpu as pltpu

HIDDEN = 768            # fixed by Linear(768, ...) in the module
NUM_CLASS_LABELS = 4    # Config.num_class_labels (synthetic, deterministic choice)


def _fused_heads_kernel(x_ref, w_ref, b_ref, out_ref):
    """x_ref: (TM, H) f32 activation tile; w_ref: (H, 6C) f32; b_ref: (1, 6C) f32."""
    acc = jnp.dot(x_ref[...], w_ref[...], preferred_element_type=jnp.float32)
    out_ref[...] = acc + b_ref[...]        # single 2-D broadcast bias add


@functools.partial(jax.jit, static_argnames=("tile_rows",))
def l2e_heads(bert_out, w1, b1, w2, b2, *, tile_rows=2048):
    """Returns (text_clf_out, span_pred_out) like L2EModel.forward."""
    B, S, H = bert_out.shape
    C = w1.shape[1]
    assert w2.shape[1] == 5 * C and w1.shape[0] == H and w2.shape[0] == H
    N = 6 * C                                     # fused head width (C + 5C)
    M = B * S

    # Row tile: multiple of 8 (sublanes), never larger than the row count.
    # Ragged remainders are handled by Pallas partial boundary blocks.
    tm = min(tile_rows, (M // 8) * 8) if M >= 8 else M
    grid = (pl.cdiv(M, tm),)

    # Free reshape (no copy); NO wrapper-side cast / pad (would double traffic).
    x = bert_out.reshape(M, H)

    # Fuse the two heads into one weight / bias (tiny, VMEM-resident).
    w = jnp.concatenate([w1, w2], axis=1)                   # (H, 6C) f32
    b = jnp.concatenate([b1, b2], axis=0).reshape(1, N)     # (1, 6C) f32

    fused = pl.pallas_call(
        _fused_heads_kernel,
        out_shape=jax.ShapeDtypeStruct((M, N), jnp.float32),
        grid=grid,
        in_specs=[
            pl.BlockSpec((tm, H), lambda i: (i, 0)),   # streamed activation tiles
            pl.BlockSpec((H, N), lambda i: (0, 0)),    # resident fused weight
            pl.BlockSpec((1, N), lambda i: (0, 0)),    # resident fused bias
        ],
        out_specs=pl.BlockSpec((tm, N), lambda i: (i, 0)),
        compiler_params=pltpu.CompilerParams(
            dimension_semantics=("parallel",),         # shard row tiles across TCs
        ),
    )(x, w, b)

    # --- split heads / slice tokens in plain JAX (cheap glue) --------------
    fused = fused.reshape(B, S, N)
    text_clf_out = fused[:, 0, :C]                                  # dense_1(CLS)
    span_pred_out = fused[:, 1:S - 1, C:].reshape(B, S - 2, C, 5)   # dense_2(span)
    return text_clf_out, span_pred_out


def reference(bert_out, w1, b1, w2, b2):
    """Pure-JAX reference of L2EModel.forward."""
    B, S, _ = bert_out.shape
    C = w1.shape[1]
    hi = jax.lax.Precision.HIGHEST
    clf = jnp.dot(bert_out[:, 0], w1, precision=hi) + b1
    span = jnp.einsum("bsh,hn->bsn", bert_out[:, 1:-1], w2, precision=hi) + b2
    return clf, span.reshape(B, S - 2, C, 5)


def _check(B, S, key):
    k_x, k_w1, k_b1, k_w2, k_b2 = jax.random.split(key, 5)
    H, C = HIDDEN, NUM_CLASS_LABELS

    # Synthetic deterministic bert output (stands in for bert(**kwargs)['last_hidden_state'])
    bert_out = jax.random.normal(k_x, (B, S, H), dtype=jnp.float32)

    # dense_1 / dense_2 params, PyTorch-Linear-style uniform(+-1/sqrt(fan_in)) init.
    bound = 1.0 / (H ** 0.5)
    w1 = jax.random.uniform(k_w1, (H, C), jnp.float32, -bound, bound)
    b1 = jax.random.uniform(k_b1, (C,), jnp.float32, -bound, bound)
    w2 = jax.random.uniform(k_w2, (H, C * 5), jnp.float32, -bound, bound)
    b2 = jax.random.uniform(k_b2, (C * 5,), jnp.float32, -bound, bound)

    clf, span = l2e_heads(bert_out, w1, b1, w2, b2)
    jax.block_until_ready((clf, span))

    clf_ref, span_ref = reference(bert_out, w1, b1, w2, b2)
    assert clf.shape == (B, C) and span.shape == (B, S - 2, C, 5)
    assert jnp.allclose(clf, clf_ref, atol=2e-3, rtol=2e-3)
    assert jnp.allclose(span, span_ref, atol=2e-3, rtol=2e-3)


if __name__ == "__main__":
    key = jax.random.PRNGKey(0)
    k0, k1 = jax.random.split(key, 2)

    # Small canonical shape (B=2, S=8) -> single 16-row tile.
    _check(2, 8, k0)
    # Ragged shape (B=3, S=37 -> M=111) exercises the partial boundary tile.
    _check(3, 37, k1)

    print("KERNEL_OK")
</pallas_src>

<mosaic_0001>
module attributes {stable_mosaic.version = 11 : i64} {
  func.func @_fused_heads_kernel(%arg0: i32, %arg1: memref<16x768xf32, #tpu.memory_space<vmem>>, %arg2: memref<768x24xf32, #tpu.memory_space<vmem>>, %arg3: memref<1x24xf32, #tpu.memory_space<vmem>>, %arg4: memref<16x24xf32, #tpu.memory_space<vmem>>) attributes {dimension_semantics = [#tpu.dimension_semantics<parallel>], iteration_bounds = array<i64: 1>, scalar_prefetch = 0 : i64, scratch_operands = 0 : i64, tpu.core_type = #tpu.core_type<tc>, window_params = [{transform_indices = @transform_0, window_bounds = array<i64: 16, 768>}, {pipeline_mode = #tpu.pipeline_mode<synchronous>, transform_indices = @transform_1, window_bounds = array<i64: 768, 24>}, {pipeline_mode = #tpu.pipeline_mode<synchronous>, transform_indices = @transform_2, window_bounds = array<i64: 1, 24>}, {transform_indices = @transform_3, window_bounds = array<i64: 16, 24>}]} {
    %c0 = arith.constant 0 : index
    %c0_0 = arith.constant 0 : index
    %0 = vector.load %arg1[%c0, %c0_0] : memref<16x768xf32, #tpu.memory_space<vmem>>, vector<16x768xf32>
    %c0_1 = arith.constant 0 : index
    %c0_2 = arith.constant 0 : index
    %1 = vector.load %arg2[%c0_1, %c0_2] : memref<768x24xf32, #tpu.memory_space<vmem>>, vector<768x24xf32>
    %cst = arith.constant dense<0.000000e+00> : vector<16x24xf32>
    %2 = tpu.matmul %0, %1, %cst {dimension_numbers = #tpu.dot_dimension_numbers<[1], [0], [0], [1], [0, 0, 1, 1], [], []>} : vector<16x768xf32>, vector<768x24xf32>, vector<16x24xf32> -> vector<16x24xf32>
    %c0_3 = arith.constant 0 : index
    %c0_4 = arith.constant 0 : index
    %3 = vector.load %arg3[%c0_3, %c0_4] : memref<1x24xf32, #tpu.memory_space<vmem>>, vector<1x24xf32>
    %4 = vector.broadcast %3 : vector<1x24xf32> to vector<16x24xf32>
    %5 = arith.addf %2, %4 : vector<16x24xf32>
    %c0_5 = arith.constant 0 : index
    %c0_6 = arith.constant 0 : index
    %6 = vector.load %arg4[%c0_5, %c0_6] : memref<16x24xf32, #tpu.memory_space<vmem>>, vector<16x24xf32>
    tpu.vector_store %arg4[%c0_5, %c0_6], %5 {strides = array<i32>} : memref<16x24xf32, #tpu.memory_space<vmem>>, vector<16x24xf32>,
    return
  }
  func.func @transform_0(%arg0: i32) -> (i32, i32) {
    %c0_i32 = arith.constant 0 : i32
    %c0_i32_0 = arith.constant 0 : i32
    return %arg0, %c0_i32 : i32, i32
  }
  func.func @transform_1(%arg0: i32) -> (i32, i32) {
    %c0_i32 = arith.constant 0 : i32
    %c0_i32_0 = arith.constant 0 : i32
    %c0_i32_1 = arith.constant 0 : i32
    return %c0_i32, %c0_i32_0 : i32, i32
  }
  func.func @transform_2(%arg0: i32) -> (i32, i32) {
    %c0_i32 = arith.constant 0 : i32
    %c0_i32_0 = arith.constant 0 : i32
    %c0_i32_1 = arith.constant 0 : i32
    return %c0_i32, %c0_i32_0 : i32, i32
  }
  func.func @transform_3(%arg0: i32) -> (i32, i32) {
    %c0_i32 = arith.constant 0 : i32
    %c0_i32_0 = arith.constant 0 : i32
    return %arg0, %c0_i32 : i32, i32
  }
}

</mosaic_0001>

<bundles_post_ra>
// kernel: l2e_heads.1
= control target key start
LH: loop header
LB: loop body
LE: loop exit
PB: predicated region body
PF: predicated region fallthrough
CT: control target
= control target key end

     0   :  { %vm354_vm0 = vcmask 195584   ;;  %s861_s1 = inlined_call_operand.vmem [shape: f32[768,24], index: 1, kind: input, shape index: {}]   ;;  %s862_s0 = inlined_call_operand.vmem [shape: f32[16,768], index: 0, kind: input, shape index: {}]   ;;  %s863_s2 = inlined_call_operand.vmem [shape: f32[1,24], index: 2, kind: input, shape index: {}]   ;;  %s864_s3 = inlined_call_operand.vmem [shape: f32[16,24], index: 3, kind: output, shape index: {}]  }
   0x1   :  { %v57_v0 = vld [vmem:[%s861_s1 + $0xf8] sm:$0xff]  ;;  %v56_v4 = vld [vmem:[%s861_s1 + $0xf0] sm:$0xff]  ;;  %v55_v8 = vld [vmem:[%s861_s1 + $0xe8] sm:$0xff] }
   0x2   :  { %v89_v1 = vld [vmem:[%s861_s1 + $0x1f8] sm:$0xff]  ;;  %362 = vmatprep.subr.mxu0 %v57_v0  ;;  %v88_v5 = vld [vmem:[%s861_s1 + $0x1f0] sm:$0xff]  ;;  %v87_v9 = vld [vmem:[%s861_s1 + $0x1e8] sm:$0xff] }
   0x3   :  { %v41_v2 = vld [vmem:[%s861_s1 + $0x78] sm:$0xff]  ;;  %400 = vmatprep.subr.mxu1 %v89_v1  ;;  %v40_v6 = vld [vmem:[%s861_s1 + $0x70] sm:$0xff]  ;;  %v39_v10 = vld [vmem:[%s861_s1 + $0x68] sm:$0xff] }
   0x4   :  { %v73_v3 = vld [vmem:[%s861_s1 + $0x178] sm:$0xff]  ;;  %363 = vmatpush3.msra.mxu0 %v41_v2  ;;  %v72_v7 = vld [vmem:[%s861_s1 + $0x170] sm:$0xff]  ;;  %v71_v11 = vld [vmem:[%s861_s1 + $0x168] sm:$0xff] }
   0x5   :  { %401 = vmatpush3.msra.mxu1 %v73_v3  ;;  %364 = vmatprep.subr.mxu0 %v56_v4  ;;  %v54_v12 = vld [vmem:[%s861_s1 + $0xe0] sm:$0xff]  ;;  %v53_v16 = vld [vmem:[%s861_s1 + $0xd8] sm:$0xff]  ;;  %v52_v20 = vld [vmem:[%s861_s1 + $0xd0] sm:$0xff] }
   0x6   :  { %402 = vmatprep.subr.mxu1 %v88_v5  ;;  %365 = vmatpush3.msra.mxu0 %v40_v6  ;;  %v86_v13 = vld [vmem:[%s861_s1 + $0x1e0] sm:$0xff]  ;;  %v85_v17 = vld [vmem:[%s861_s1 + $0x1d8] sm:$0xff]  ;;  %v84_v21 = vld [vmem:[%s861_s1 + $0x1d0] sm:$0xff] }
   0x7   :  { %403 = vmatpush3.msra.mxu1 %v72_v7  ;;  %366 = vmatprep.subr.mxu0 %v55_v8  ;;  %v38_v14 = vld [vmem:[%s861_s1 + $0x60] sm:$0xff]  ;;  %v37_v18 = vld [vmem:[%s861_s1 + $0x58] sm:$0xff]  ;;  %v36_v22 = vld [vmem:[%s861_s1 + $0x50] sm:$0xff] }
   0x8   :  { %404 = vmatprep.subr.mxu1 %v87_v9  ;;  %v70_v15 = vld [vmem:[%s861_s1 + $0x160] sm:$0xff]  ;;  %367 = vmatpush3.msra.mxu0 %v39_v10  ;;  %v69_v19 = vld [vmem:[%s861_s1 + $0x158] sm:$0xff]  ;;  %v68_v23 = vld [vmem:[%s861_s1 + $0x150] sm:$0xff] }
   0x9   :  { %405 = vmatpush3.msra.mxu1 %v71_v11  ;;  %368 = vmatprep.subr.mxu0 %v54_v12  ;;  %v51_v24 = vld [vmem:[%s861_s1 + $0xc8] sm:$0xff]  ;;  %v50_v28 = vld [vmem:[%s861_s1 + $0xc0] sm:$0xff]  ;;  %v49_v32 = vld [vmem:[%s861_s1 + $0xb8] sm:$0xff] }
   0xa   :  { %406 = vmatprep.subr.mxu1 %v86_v13  ;;  %369 = vmatpush3.msra.mxu0 %v38_v14  ;;  %v83_v25 = vld [vmem:[%s861_s1 + $0x1c8] sm:$0xff]  ;;  %v82_v29 = vld [vmem:[%s861_s1 + $0x1c0] sm:$0xff]  ;;  %v81_v33 = vld [vmem:[%s861_s1 + $0x1b8] sm:$0xff] }
   0xb   :  { %407 = vmatpush3.msra.mxu1 %v70_v15  ;;  %370 = vmatprep.subr.mxu0 %v53_v16  ;;  %v35_v26 = vld [vmem:[%s861_s1 + $0x48] sm:$0xff]  ;;  %v34_v30 = vld [vmem:[%s861_s1 + $0x40] sm:$0xff]  ;;  %v33_v34 = vld [vmem:[%s861_s1 + $0x38] sm:$0xff] }
   0xc   :  { %408 = vmatprep.subr.mxu1 %v85_v17  ;;  %371 = vmatpush3.msra.mxu0 %v37_v18  ;;  %v67_v27 = vld [vmem:[%s861_s1 + $0x148] sm:$0xff]  ;;  %v66_v31 = vld [vmem:[%s861_s1 + $0x140] sm:$0xff]  ;;  %v65_v35 = vld [vmem:[%s861_s1 + $0x138] sm:$0xff] }
   0xd   :  { %409 = vmatpush3.msra.mxu1 %v69_v19  ;;  %372 = vmatprep.subr.mxu0 %v52_v20  ;;  %v48_v36 = vld [vmem:[%s861_s1 + $0xb0] sm:$0xff]  ;;  %v47_v40 = vld [vmem:[%s861_s1 + $0xa8] sm:$0xff]  ;;  %v46_v44 = vld [vmem:[%s861_s1 + $0xa0] sm:$0xff] }
   0xe   :  { %410 = vmatprep.subr.mxu1 %v84_v21  ;;  %373 = vmatpush3.msra.mxu0 %v36_v22  ;;  %v80_v37 = vld [vmem:[%s861_s1 + $0x1b0] sm:$0xff]  ;;  %v79_v41 = vld [vmem:[%s861_s1 + $0x1a8] sm:$0xff]  ;;  %v78_v45 = vld [vmem:[%s861_s1 + $0x1a0] sm:$0xff] }
   0xf   :  { %411 = vmatpush3.msra.mxu1 %v68_v23  ;;  %374 = vmatprep.subr.mxu0 %v51_v24  ;;  %v32_v38 = vld [vmem:[%s861_s1 + $0x30] sm:$0xff]  ;;  %v31_v42 = vld [vmem:[%s861_s1 + $0x28] sm:$0xff]  ;;  %v30_v46 = vld [vmem:[%s861_s1 + $0x20] sm:$0xff] }
  0x10   :  { %412 = vmatprep.subr.mxu1 %v83_v25  ;;  %375 = vmatpush3.msra.mxu0 %v35_v26  ;;  %v64_v39 = vld [vmem:[%s861_s1 + $0x130] sm:$0xff]  ;;  %v63_v43 = vld [vmem:[%s861_s1 + $0x128] sm:$0xff]  ;;  %v62_v47 = vld [vmem:[%s861_s1 + $0x120] sm:$0xff] }
  0x11   :  { %413 = vmatpush3.msra.mxu1 %v67_v27  ;;  %376 = vmatprep.subr.mxu0 %v50_v28  ;;  %v45_v48 = vld [vmem:[%s861_s1 + $0x98] sm:$0xff]  ;;  %v44_v52 = vld [vmem:[%s861_s1 + $0x90] sm:$0xff]  ;;  %v43_v56 = vld [vmem:[%s861_s1 + $0x88] sm:$0xff] }
  0x12   :  { %414 = vmatprep.subr.mxu1 %v82_v29  ;;  %377 = vmatpush3.msra.mxu0 %v34_v30  ;;  %v77_v49 = vld [vmem:[%s861_s1 + $0x198] sm:$0xff]  ;;  %v76_v53 = vld [vmem:[%s861_s1 + $0x190] sm:$0xff]  ;;  %v75_v57 = vld [vmem:[%s861_s1 + $0x188] sm:$0xff] }
  0x13   :  { %415 = vmatpush3.msra.mxu1 %v66_v31  ;;  %378 = vmatprep.subr.mxu0 %v49_v32  ;;  %v29_v50 = vld [vmem:[%s861_s1 + $0x18] sm:$0xff]  ;;  %v28_v54 = vld [vmem:[%s861_s1 + $0x10] sm:$0xff]  ;;  %v27_v58 = vld [vmem:[%s861_s1 + $0x8] sm:$0xff] }
  0x14   :  { %416 = vmatprep.subr.mxu1 %v81_v33  ;;  %379 = vmatpush3.msra.mxu0 %v33_v34  ;;  %v61_v51 = vld [vmem:[%s861_s1 + $0x118] sm:$0xff]  ;;  %v60_v55 = vld [vmem:[%s861_s1 + $0x110] sm:$0xff]  ;;  %v59_v59 = vld [vmem:[%s861_s1 + $0x108] sm:$0xff] }
  0x15   :  { %417 = vmatpush3.msra.mxu1 %v65_v35  ;;  %380 = vmatprep.subr.mxu0 %v48_v36  ;;  %v42_v60 = vld [vmem:[%s861_s1 + $0x80] sm:$0xff]  ;;  %v15_v63 = vld [vmem:[%s862_s0 + $0x8] sm:$0xff]  ;;  %v17_v1 = vld [vmem:[%s862_s0 + $0x18] sm:$0xff] }
  0x16   :  { %418 = vmatprep.subr.mxu1 %v80_v37  ;;  %381 = vmatpush3.msra.mxu0 %v32_v38  ;;  %v74_v61 = vld [vmem:[%s861_s1 + $0x180] sm:$0xff]  ;;  %v16_v3 = vld [vmem:[%s862_s0 + $0x10] sm:$0xff]  ;;  %v121_v4 = vld [vmem:[%s861_s1 + $0x2f8] sm:$0xff] }
  0x17   :  { %419 = vmatpush3.msra.mxu1 %v64_v39  ;;  %382 = vmatprep.subr.mxu0 %v47_v40  ;;  %v26_v62 = vld [vmem:[%s861_s1] sm:$0xff]  ;;  %v105_v5 = vld [vmem:[%s861_s1 + $0x278] sm:$0xff]  ;;  %v120_v6 = vld [vmem:[%s861_s1 + $0x2f0] sm:$0xff] }
  0x18   :  { %420 = vmatprep.subr.mxu1 %v79_v41  ;;  %383 = vmatpush3.msra.mxu0 %v31_v42  ;;  %v58_v0 = vld [vmem:[%s861_s1 + $0x100] sm:$0xff]  ;;  %v104_v7 = vld [vmem:[%s861_s1 + $0x270] sm:$0xff]  ;;  %v119_v8 = vld [vmem:[%s861_s1 + $0x2e8] sm:$0xff] }
  0x19   :  { %421 = vmatpush3.msra.mxu1 %v63_v43  ;;  %384 = vmatprep.subr.mxu0 %v46_v44  ;;  %v14_v2 = vld [vmem:[%s862_s0] sm:$0xff]  ;;  %v103_v9 = vld [vmem:[%s861_s1 + $0x268] sm:$0xff]  ;;  %v117_v12 = vld [vmem:[%s861_s1 + $0x2d8] sm:$0xff] }
  0x1a   :  { %422 = vmatprep.subr.mxu1 %v78_v45  ;;  %385 = vmatpush3.msra.mxu0 %v30_v46  ;;  %v118_v10 = vld [vmem:[%s861_s1 + $0x2e0] sm:$0xff]  ;;  %v101_v13 = vld [vmem:[%s861_s1 + $0x258] sm:$0xff]  ;;  %v116_v14 = vld [vmem:[%s861_s1 + $0x2d0] sm:$0xff] }
  0x1b   :  { %423 = vmatpush3.msra.mxu1 %v62_v47  ;;  %386 = vmatprep.subr.mxu0 %v45_v48  ;;  %v102_v11 = vld [vmem:[%s861_s1 + $0x260] sm:$0xff]  ;;  %v100_v15 = vld [vmem:[%s861_s1 + $0x250] sm:$0xff]  ;;  %v115_v16 = vld [vmem:[%s861_s1 + $0x2c8] sm:$0xff] }
  0x1c   :  { %424 = vmatprep.subr.mxu1 %v77_v49  ;;  %387 = vmatpush3.msra.mxu0 %v29_v50  ;;  %v99_v17 = vld [vmem:[%s861_s1 + $0x248] sm:$0xff]  ;;  %v114_v18 = vld [vmem:[%s861_s1 + $0x2c0] sm:$0xff]  ;;  %v113_v20 = vld [vmem:[%s861_s1 + $0x2b8] sm:$0xff] }
  0x1d   :  { %425 = vmatpush3.msra.mxu1 %v61_v51  ;;  %388 = vmatprep.subr.mxu0 %v44_v52  ;;  %v98_v19 = vld [vmem:[%s861_s1 + $0x240] sm:$0xff]  ;;  %v97_v21 = vld [vmem:[%s861_s1 + $0x238] sm:$0xff]  ;;  %v112_v22 = vld [vmem:[%s861_s1 + $0x2b0] sm:$0xff] }
  0x1e   :  { %426 = vmatprep.subr.mxu1 %v76_v53  ;;  %389 = vmatpush3.msra.mxu0 %v28_v54  ;;  %v96_v23 = vld [vmem:[%s861_s1 + $0x230] sm:$0xff]  ;;  %v111_v24 = vld [vmem:[%s861_s1 + $0x2a8] sm:$0xff]  ;;  %v110_v26 = vld [vmem:[%s861_s1 + $0x2a0] sm:$0xff] }
  0x1f   :  { %427 = vmatpush3.msra.mxu1 %v60_v55  ;;  %390 = vmatprep.subr.mxu0 %v43_v56  ;;  %v95_v25 = vld [vmem:[%s861_s1 + $0x228] sm:$0xff]  ;;  %v21_v27 = vld [vmem:[%s862_s0 + $0x38] sm:$0xff]  ;;  %v94_v28 = vld [vmem:[%s861_s1 + $0x220] sm:$0xff] }
  0x20   :  { %428 = vmatprep.subr.mxu1 %v75_v57  ;;  %391 = vmatpush3.msra.mxu0 %v27_v58  ;;  %v20_v29 = vld [vmem:[%s862_s0 + $0x30] sm:$0xff]  ;;  %v109_v30 = vld [vmem:[%s861_s1 + $0x298] sm:$0xff]  ;;  %v23_v31 = vld [vmem:[%s862_s0 + $0x48] sm:$0xff] }
  0x21   :  { %429 = vmatpush3.msra.mxu1 %v59_v59  ;;  %392 = vmatprep.subr.mxu0 %v42_v60  ;;  %v93_v32 = vld [vmem:[%s861_s1 + $0x218] sm:$0xff]  ;;  %v108_v33 = vld [vmem:[%s861_s1 + $0x290] sm:$0xff]  ;;  %v22_v34 = vld [vmem:[%s862_s0 + $0x40] sm:$0xff] }
  0x22   :  { %430 = vmatprep.subr.mxu1 %v74_v61  ;;  %393 = vmatpush3.msra.mxu0 %v26_v62  ;;  %v92_v35 = vld [vmem:[%s861_s1 + $0x210] sm:$0xff]  ;;  %v107_v36 = vld [vmem:[%s861_s1 + $0x288] sm:$0xff]  ;;  %v106_v38 = vld [vmem:[%s861_s1 + $0x280] sm:$0xff] }
  0x23   :  { %193 = vmatprep.mubr.f32.mxu0 %v15_v63  ;;  %431 = vmatpush3.msra.mxu1 %v58_v0  ;;  %v91_v37 = vld [vmem:[%s861_s1 + $0x208] sm:$0xff]  ;;  %v90_v39 = vld [vmem:[%s861_s1 + $0x200] sm:$0xff]  ;;  %v25_v41 = vld [vmem:[%s862_s0 + $0x58] sm:$0xff] }
  0x24   :  { %268 = vmatprep.mubr.f32.mxu1 %v17_v1  ;;  %194 = vmatmul.mubr.f32.vlgmr.msra.gmra.mxu0 %v14_v2  ;;  %v19_v40 = vld [vmem:[%s862_s0 + $0x28] sm:$0xff]  ;;  %v18_v42 = vld [vmem:[%s862_s0 + $0x20] sm:$0xff]  ;;  %v24_v43 = vld [vmem:[%s862_s0 + $0x50] sm:$0xff] }
  0x25   :  { %269 = vmatmul.mubr.f32.vlgmr.msra.gmra.mxu1 %v16_v3  ;;  %438 = vmatprep.subr.mxu0 %v121_v4  ;;  %v361_v53 = vld [vmem:[%s863_s2] ss:$0 sm:$0xff] }
  0x26   :  { %476 = vmatprep.subr.mxu1 %v121_v4  ;;  %439 = vmatpush3.msra.mxu0 %v105_v5 }
  0x27   :  { %492 = vmatpush3.msra.mxu1 %v105_v5  ;;  %440 = vmatprep.subr.mxu0 %v120_v6 }
  0x28   :  { %477 = vmatprep.subr.mxu1 %v120_v6  ;;  %441 = vmatpush3.msra.mxu0 %v104_v7 }
  0x29   :  { %493 = vmatpush3.msra.mxu1 %v104_v7  ;;  %442 = vmatprep.subr.mxu0 %v119_v8 }
  0x2a   :  { %478 = vmatprep.subr.mxu1 %v119_v8  ;;  %443 = vmatpush3.msra.mxu0 %v103_v9 }
  0x2b   :  { %494 = vmatpush3.msra.mxu1 %v103_v9  ;;  %444 = vmatprep.subr.mxu0 %v118_v10 }
  0x2c   :  { %479 = vmatprep.subr.mxu1 %v118_v10  ;;  %445 = vmatpush3.msra.mxu0 %v102_v11 }
  0x2d   :  { %495 = vmatpush3.msra.mxu1 %v102_v11  ;;  %446 = vmatprep.subr.mxu0 %v117_v12 }
  0x2e   :  { %480 = vmatprep.subr.mxu1 %v117_v12  ;;  %447 = vmatpush3.msra.mxu0 %v101_v13 }
  0x2f   :  { %496 = vmatpush3.msra.mxu1 %v101_v13  ;;  %448 = vmatprep.subr.mxu0 %v116_v14 }
  0x30   :  { %481 = vmatprep.subr.mxu1 %v116_v14  ;;  %449 = vmatpush3.msra.mxu0 %v100_v15 }
  0x31   :  { %497 = vmatpush3.msra.mxu1 %v100_v15  ;;  %450 = vmatprep.subr.mxu0 %v115_v16 }
  0x32   :  { %482 = vmatprep.subr.mxu1 %v115_v16  ;;  %451 = vmatpush3.msra.mxu0 %v99_v17 }
  0x33   :  { %498 = vmatpush3.msra.mxu1 %v99_v17  ;;  %452 = vmatprep.subr.mxu0 %v114_v18 }
  0x34   :  { %483 = vmatprep.subr.mxu1 %v114_v18  ;;  %453 = vmatpush3.msra.mxu0 %v98_v19 }
  0x35   :  { %499 = vmatpush3.msra.mxu1 %v98_v19  ;;  %454 = vmatprep.subr.mxu0 %v113_v20 }
  0x36   :  { %484 = vmatprep.subr.mxu1 %v113_v20  ;;  %455 = vmatpush3.msra.mxu0 %v97_v21 }
  0x37   :  { %500 = vmatpush3.msra.mxu1 %v97_v21  ;;  %456 = vmatprep.subr.mxu0 %v112_v22 }
  0x38   :  { %485 = vmatprep.subr.mxu1 %v112_v22  ;;  %457 = vmatpush3.msra.mxu0 %v96_v23 }
  0x39   :  { %501 = vmatpush3.msra.mxu1 %v96_v23  ;;  %458 = vmatprep.subr.mxu0 %v111_v24 }
  0x3a   :  { %486 = vmatprep.subr.mxu1 %v111_v24  ;;  %459 = vmatpush3.msra.mxu0 %v95_v25 }
  0x3b   :  { %502 = vmatpush3.msra.mxu1 %v95_v25  ;;  %460 = vmatprep.subr.mxu0 %v110_v26 }
  0x3c   :  { %487 = vmatprep.subr.mxu1 %v110_v26  ;;  %198 = vmatprep.mubr.f32.mxu0 %v21_v27 }
  0x3d   :  { %461 = vmatpush3.msra.mxu0 %v94_v28  ;;  %503 = vmatpush3.msra.mxu1 %v94_v28 }
  0x3e   :  { %199 = vmatmul.mubr.f32.gmra.mxu0 %v20_v29  ;;  %462 = vmatprep.subr.mxu0 %v109_v30 }
  0x3f   :  { %488 = vmatprep.subr.mxu1 %v109_v30  ;;  %273 = vmatprep.mubr.f32.mxu1 %v23_v31 }
  0x40   :  { %463 = vmatpush3.msra.mxu0 %v93_v32  ;;  %504 = vmatpush3.msra.mxu1 %v93_v32 }
  0x41   :  { %464 = vmatprep.subr.mxu0 %v108_v33  ;;  %274 = vmatmul.mubr.f32.gmra.mxu1 %v22_v34 }
  0x42   :  { %489 = vmatprep.subr.mxu1 %v108_v33  ;;  %465 = vmatpush3.msra.mxu0 %v92_v35 }
  0x43   :  { %505 = vmatpush3.msra.mxu1 %v92_v35  ;;  %466 = vmatprep.subr.mxu0 %v107_v36 }
  0x44   :  { %490 = vmatprep.subr.mxu1 %v107_v36  ;;  %467 = vmatpush3.msra.mxu0 %v91_v37 }
  0x45   :  { %506 = vmatpush3.msra.mxu1 %v91_v37  ;;  %468 = vmatprep.subr.mxu0 %v106_v38 }
  0x46   :  { %491 = vmatprep.subr.mxu1 %v106_v38  ;;  %469 = vmatpush3.msra.mxu0 %v90_v39 }
  0x47   :  { %507 = vmatpush3.msra.mxu1 %v90_v39  ;;  %343 = vmatprep.mubr.f32.mxu0 %v19_v40 }
  0x48   :  { %348 = vmatprep.mubr.f32.mxu1 %v25_v41  ;;  %344 = vmatmul.mubr.f32.vlgmr.msra.gmra.mxu0 %v18_v42 }
  0x49   :  { %349 = vmatmul.mubr.f32.vlgmr.msra.gmra.mxu1 %v24_v43 }
  0xe4   :  { %v394_v44 = vpop.f32.mrf.mxu0 }
  0xe5   :  { %v432_v45 = vpop.f32.mrf.mxu1 }
  0xe6   :  { %v395_v46 = vpop.f32.mrf.mxu0 }
  0xe7   :  { %v433_v48 = vpop.f32.mrf.mxu1  ;;  %v396_v51 = vadd.f32 %v395_v46, %v394_v44 }
  0xe8   :  { %v434_v60 = vadd.f32 %v433_v48, %v432_v45 }
  0xe9   :  { %v196_v55 = vadd.f32 %v396_v51, %v361_v53 }
  0xeb   :  { %v271_v63 = vadd.f32 %v434_v60, %v196_v55 }
  0xfe   :  { %v397_v47 = vpop.f32.mrf.mxu0 }
 0x100   :  { %v398_v49 = vpop.f32.mrf.mxu0 }
 0x101   :  { %v435_v50 = vpop.f32.mrf.mxu1  ;;  %v399_v52 = vadd.f32 %v398_v49, %v397_v47 }
 0x103   :  { %v436_v54 = vpop.f32.mrf.mxu1  ;;  %v201_v56 = vadd.f32 %v399_v52, %v361_v53 }
 0x104   :  { %v437_v57 = vadd.f32 %v436_v54, %v435_v50 }
 0x106   :  { %v276_v0 = vadd.f32 %v437_v57, %v201_v56 }
 0x108   :  { %v470_v58 = vpop.f32.mrf.mxu0 }
 0x109   :  { %v473_v59 = vpop.f32.mrf.mxu1 }
 0x10a   :  { %v471_v61 = vpop.f32.mrf.mxu0 }
 0x10b   :  { %v474_v62 = vpop.f32.mrf.mxu1  ;;  %v472_v1 = vadd.f32 %v471_v61, %v470_v58 }
 0x10c   :  { %v475_v2 = vadd.f32 %v474_v62, %v473_v59 }
 0x10d   :  { %v346_v3 = vadd.f32 %v472_v1, %v271_v63 }
 0x10e   :  { %v351_v4 = vadd.f32 %v475_v2, %v276_v0 }
 0x10f   :  { %355 = vst.msk [vmem:[%s864_s3] sm:$0xff] %vm354_vm0, %v346_v3 }
 0x110   :  { %356 = vst.msk [vmem:[%s864_s3 + $0x8] sm:$0xff] %vm354_vm0, %v351_v4 }

</bundles_post_ra>
